<compile_context>
chip_gen: v7x
topology: tpu7x:2x2x1
jax: 0.10.0
libtpu: 0.0.40
codegen_flags: <defaults>
</compile_context>

<pallas_src>
import jax
import jax.numpy as jnp
from jax.experimental import pallas as pl
from jax.experimental.pallas import tpu as pltpu

LANE = 128      # TPU lane width (last dim)
SUBLANE = 8     # f32 sublane width (second-to-last dim)


def _round_up(n, m):
    return ((n + m - 1) // m) * m


def _choose_batch_tile(batch, block_b):
    """Batch tile: multiple of 8 sublanes, capped by block_b, and split so the
    parallel grid axis has >= 2 blocks for mid-size batches (v7x has 2 TCs)."""
    tb = min(_round_up(block_b, SUBLANE), _round_up(batch, SUBLANE))
    if batch > SUBLANE and -(-batch // tb) < 2:
        tb = max(SUBLANE, _round_up(-(-batch // 2), SUBLANE))
    return tb


def mlp_kernel(x_ref, w1_ref, b1_ref, w2_ref, b2_ref, o_ref):
    # fc1: x @ W1 + b1  (MXU matmul, f32 accumulate); bias broadcasts over rows
    h = jnp.dot(x_ref[...].astype(w1_ref.dtype), w1_ref[...],
                preferred_element_type=jnp.float32)
    h = jnp.maximum(h + b1_ref[...], 0.0)          # bias-add + ReLU on VPU, f32
    # fc2: h @ W2 + b2
    out = jnp.dot(h.astype(w2_ref.dtype), w2_ref[...],
                  preferred_element_type=jnp.float32)
    o_ref[...] = (out + b2_ref[...]).astype(o_ref.dtype)


def route_optimizer_forward(x, w1, b1, w2, b2, *, block_b=1024):
    """relu(x @ w1 + b1) @ w2 + b2 via a batch-tiled Pallas kernel.

    x:  (B, IN)   w1: (IN, HID)   b1: (HID,) or (1, HID)
                  w2: (HID, OUT)  b2: (OUT,) or (1, OUT)
    x / w1 / w2 may be f32 or bf16 (f32 accumulation either way).
    """
    B, in_size = x.shape
    hid = w1.shape[1]
    out_size = w2.shape[1]

    # Only the hidden dim is padded (tiny, one-time, weights only) so both
    # MXU contractions stay lane-aligned.  Padded hidden units see zero weight
    # + zero bias -> relu(0)=0 -> zero W2 rows, so the math is unchanged.
    hid_p = _round_up(hid, LANE)
    w1_p = jnp.pad(w1, ((0, 0), (0, hid_p - hid)))
    b1_p = jnp.pad(b1.reshape(1, -1).astype(jnp.float32),
                   ((0, 0), (0, hid_p - hid)))
    w2_p = jnp.pad(w2, ((0, hid_p - hid), (0, 0)))
    b2_p = b2.reshape(1, -1).astype(jnp.float32)

    tb = _choose_batch_tile(B, block_b)
    num_blocks = pl.cdiv(B, tb)   # ragged last block handled by Pallas masking

    itemsize = jnp.dtype(x.dtype).itemsize
    cost = pl.CostEstimate(
        flops=2 * B * (in_size * hid + hid * out_size),
        transcendentals=0,
        bytes_accessed=(B * in_size * itemsize                       # x read
                        + w1_p.size * jnp.dtype(w1_p.dtype).itemsize
                        + b1_p.size * 4
                        + w2_p.size * jnp.dtype(w2_p.dtype).itemsize
                        + b2_p.size * 4
                        + B * out_size * itemsize))                  # out write

    out = pl.pallas_call(
        mlp_kernel,
        out_shape=jax.ShapeDtypeStruct((B, out_size), x.dtype),
        grid=(num_blocks,),
        in_specs=[
            # batch-tiled activations, UNPADDED feature dim (== full array dim)
            pl.BlockSpec((tb, in_size), lambda i: (i, 0)),
            # weights/biases: same block every grid step -> VMEM-resident
            pl.BlockSpec((in_size, hid_p), lambda i: (0, 0)),
            pl.BlockSpec((1, hid_p), lambda i: (0, 0)),
            pl.BlockSpec((hid_p, out_size), lambda i: (0, 0)),
            pl.BlockSpec((1, out_size), lambda i: (0, 0)),
        ],
        # unpadded output: masked stores in-kernel, ~25x less HBM writeback
        out_specs=pl.BlockSpec((tb, out_size), lambda i: (i, 0)),
        compiler_params=pltpu.CompilerParams(
            dimension_semantics=("parallel",)),   # shards tiles across v7x TCs
        cost_estimate=cost,
    )(x, w1_p, b1_p, w2_p, b2_p)

    return out


def init_params(key, input_size=10, hidden_size=20, output_size=5,
                dtype=jnp.float32):
    """Deterministic init mimicking nn.Linear's uniform(-1/sqrt(fan_in), +...)."""
    k1, k2, k3, k4 = jax.random.split(key, 4)
    bound1 = 1.0 / (input_size ** 0.5)
    bound2 = 1.0 / (hidden_size ** 0.5)
    # stored as (in, out) = torch weight transposed
    w1 = jax.random.uniform(k1, (input_size, hidden_size), dtype,
                            minval=-bound1, maxval=bound1)
    b1 = jax.random.uniform(k2, (hidden_size,), dtype,
                            minval=-bound1, maxval=bound1)
    w2 = jax.random.uniform(k3, (hidden_size, output_size), dtype,
                            minval=-bound2, maxval=bound2)
    b2 = jax.random.uniform(k4, (output_size,), dtype,
                            minval=-bound2, maxval=bound2)
    return w1, b1, w2, b2


def _ref_forward(x, w1, b1, w2, b2):
    return jnp.maximum(x @ w1 + b1.reshape(1, -1), 0.0) @ w2 + b2.reshape(1, -1)


if __name__ == "__main__":
    key = jax.random.PRNGKey(0)
    kx, kp, kbig = jax.random.split(key, 3)

    IN, HID, OUT = 10, 20, 5
    w1, b1, w2, b2 = init_params(kp, IN, HID, OUT)

    fwd = jax.jit(route_optimizer_forward)

    # --- small-shape check (matches the torch module's natural sizes) -------
    B = 8
    x = jax.random.normal(kx, (B, IN), dtype=jnp.float32)
    out = fwd(x, w1, b1, w2, b2)
    jax.block_until_ready(out)
    ref = _ref_forward(x, w1, b1, w2, b2)
    assert out.shape == (B, OUT)
    assert jnp.allclose(out, ref, atol=1e-5, rtol=1e-5)

    # --- larger ragged batch: grid > 1, weight residency, masked last block -
    B_big = 1025  # deliberately not a multiple of the tile
    x_big = jax.random.normal(kbig, (B_big, IN), dtype=jnp.float32)
    out_big = fwd(x_big, w1, b1, w2, b2)
    jax.block_until_ready(out_big)
    ref_big = _ref_forward(x_big, w1, b1, w2, b2)
    assert out_big.shape == (B_big, OUT)
    assert jnp.allclose(out_big, ref_big, atol=1e-5, rtol=1e-5)

    # --- bf16 transfer path: halves dominant HBM bytes, f32 accumulation ----
    x_bf = x_big.astype(jnp.bfloat16)
    w1_bf = w1.astype(jnp.bfloat16)
    w2_bf = w2.astype(jnp.bfloat16)
    out_bf = fwd(x_bf, w1_bf, b1, w2_bf, b2)
    jax.block_until_ready(out_bf)
    assert out_bf.shape == (B_big, OUT) and out_bf.dtype == jnp.bfloat16
    # reference uses the bf16-quantized operand values in f32, so the only
    # residual error is accumulation order + the final bf16 output cast.
    ref_bf = _ref_forward(x_bf.astype(jnp.float32), w1_bf.astype(jnp.float32),
                          b1, w2_bf.astype(jnp.float32), b2)
    assert jnp.allclose(out_bf.astype(jnp.float32), ref_bf, atol=2e-2, rtol=2e-2)

    print("KERNEL_OK")
</pallas_src>

<mosaic_0001>
module attributes {stable_mosaic.version = 11 : i64} {
  func.func @mlp_kernel(%arg0: i32, %arg1: memref<8x10xf32, #tpu.memory_space<vmem>>, %arg2: memref<10x128xf32, #tpu.memory_space<vmem>>, %arg3: memref<1x128xf32, #tpu.memory_space<vmem>>, %arg4: memref<128x5xf32, #tpu.memory_space<vmem>>, %arg5: memref<1x5xf32, #tpu.memory_space<vmem>>, %arg6: memref<8x5xf32, #tpu.memory_space<vmem>>) attributes {dimension_semantics = [#tpu.dimension_semantics<parallel>], iteration_bounds = array<i64: 1>, scalar_prefetch = 0 : i64, scratch_operands = 0 : i64, tpu.core_type = #tpu.core_type<tc>, window_params = [{transform_indices = @transform_0, window_bounds = array<i64: 8, 10>}, {pipeline_mode = #tpu.pipeline_mode<synchronous>, transform_indices = @transform_1, window_bounds = array<i64: 10, 128>}, {pipeline_mode = #tpu.pipeline_mode<synchronous>, transform_indices = @transform_2, window_bounds = array<i64: 1, 128>}, {pipeline_mode = #tpu.pipeline_mode<synchronous>, transform_indices = @transform_3, window_bounds = array<i64: 128, 5>}, {pipeline_mode = #tpu.pipeline_mode<synchronous>, transform_indices = @transform_4, window_bounds = array<i64: 1, 5>}, {transform_indices = @transform_5, window_bounds = array<i64: 8, 5>}]} {
    %c0 = arith.constant 0 : index
    %c0_0 = arith.constant 0 : index
    %0 = vector.load %arg1[%c0, %c0_0] : memref<8x10xf32, #tpu.memory_space<vmem>>, vector<8x10xf32>
    %c0_1 = arith.constant 0 : index
    %c0_2 = arith.constant 0 : index
    %1 = vector.load %arg2[%c0_1, %c0_2] : memref<10x128xf32, #tpu.memory_space<vmem>>, vector<10x128xf32>
    %cst = arith.constant dense<0.000000e+00> : vector<8x128xf32>
    %2 = tpu.matmul %0, %1, %cst {dimension_numbers = #tpu.dot_dimension_numbers<[1], [0], [0], [1], [0, 0, 1, 1], [], []>} : vector<8x10xf32>, vector<10x128xf32>, vector<8x128xf32> -> vector<8x128xf32>
    %c0_3 = arith.constant 0 : index
    %c0_4 = arith.constant 0 : index
    %3 = vector.load %arg3[%c0_3, %c0_4] : memref<1x128xf32, #tpu.memory_space<vmem>>, vector<1x128xf32>
    %4 = vector.broadcast %3 : vector<1x128xf32> to vector<8x128xf32>
    %5 = arith.addf %2, %4 : vector<8x128xf32>
    %cst_5 = arith.constant 0.000000e+00 : f32
    %6 = vector.broadcast %cst_5 : f32 to vector<8x128xf32>
    %7 = arith.maximumf %5, %6 : vector<8x128xf32>
    %c0_6 = arith.constant 0 : index
    %c0_7 = arith.constant 0 : index
    %8 = vector.load %arg4[%c0_6, %c0_7] : memref<128x5xf32, #tpu.memory_space<vmem>>, vector<128x5xf32>
    %cst_8 = arith.constant dense<0.000000e+00> : vector<8x5xf32>
    %9 = tpu.matmul %7, %8, %cst_8 {dimension_numbers = #tpu.dot_dimension_numbers<[1], [0], [0], [1], [0, 0, 1, 1], [], []>} : vector<8x128xf32>, vector<128x5xf32>, vector<8x5xf32> -> vector<8x5xf32>
    %c0_9 = arith.constant 0 : index
    %c0_10 = arith.constant 0 : index
    %10 = vector.load %arg5[%c0_9, %c0_10] : memref<1x5xf32, #tpu.memory_space<vmem>>, vector<1x5xf32>
    %11 = vector.broadcast %10 : vector<1x5xf32> to vector<8x5xf32>
    %12 = arith.addf %9, %11 : vector<8x5xf32>
    %c0_11 = arith.constant 0 : index
    %c0_12 = arith.constant 0 : index
    %13 = vector.load %arg6[%c0_11, %c0_12] : memref<8x5xf32, #tpu.memory_space<vmem>>, vector<8x5xf32>
    tpu.vector_store %arg6[%c0_11, %c0_12], %12 {strides = array<i32>} : memref<8x5xf32, #tpu.memory_space<vmem>>, vector<8x5xf32>,
    return
  }
  func.func @transform_0(%arg0: i32) -> (i32, i32) {
    %c0_i32 = arith.constant 0 : i32
    %c0_i32_0 = arith.constant 0 : i32
    return %arg0, %c0_i32 : i32, i32
  }
  func.func @transform_1(%arg0: i32) -> (i32, i32) {
    %c0_i32 = arith.constant 0 : i32
    %c0_i32_0 = arith.constant 0 : i32
    %c0_i32_1 = arith.constant 0 : i32
    return %c0_i32, %c0_i32_0 : i32, i32
  }
  func.func @transform_2(%arg0: i32) -> (i32, i32) {
    %c0_i32 = arith.constant 0 : i32
    %c0_i32_0 = arith.constant 0 : i32
    %c0_i32_1 = arith.constant 0 : i32
    return %c0_i32, %c0_i32_0 : i32, i32
  }
  func.func @transform_3(%arg0: i32) -> (i32, i32) {
    %c0_i32 = arith.constant 0 : i32
    %c0_i32_0 = arith.constant 0 : i32
    %c0_i32_1 = arith.constant 0 : i32
    return %c0_i32, %c0_i32_0 : i32, i32
  }
  func.func @transform_4(%arg0: i32) -> (i32, i32) {
    %c0_i32 = arith.constant 0 : i32
    %c0_i32_0 = arith.constant 0 : i32
    %c0_i32_1 = arith.constant 0 : i32
    return %c0_i32, %c0_i32_0 : i32, i32
  }
  func.func @transform_5(%arg0: i32) -> (i32, i32) {
    %c0_i32 = arith.constant 0 : i32
    %c0_i32_0 = arith.constant 0 : i32
    return %arg0, %c0_i32 : i32, i32
  }
}

</mosaic_0001>

<bundles_post_ra>
// kernel: route_optimizer_forward.1
= control target key start
LH: loop header
LB: loop body
LE: loop exit
PB: predicated region body
PF: predicated region fallthrough
CT: control target
= control target key end

     0   :  { %vm35_vm0 = vcmask 1041408   ;;  %v342_v2 = vmov 0.0|0.0   ;;  %vm343_vm1 = vmmov 1   ;;  %vm344_vm3 = vmmov 0   ;;  %s452_s0 = inlined_call_operand.vmem [shape: f32[8,10], index: 0, kind: input, shape index: {}]   ;;  %s453_s1 = inlined_call_operand.vmem [shape: f32[10,128], index: 1, kind: input, shape index: {}]   ;;  %s454_s2 = inlined_call_operand.vmem [shape: f32[1,128], index: 2, kind: input, shape index: {}]   ;;  %s455_s3 = inlined_call_operand.vmem [shape: f32[128,5], index: 3, kind: input, shape index: {}]   ;;  %s456_s4 = inlined_call_operand.vmem [shape: f32[1,5], index: 4, kind: input, shape index: {}]   ;;  %s457_s5 = inlined_call_operand.hbm [shape: f32[8,5], index: 5, kind: output, shape index: {}]  }
   0x1   :  { %v22_v0 = vld [vmem:[%s453_s1] sm:$0xff]  ;;  %v23_v1 = vld [vmem:[%s453_s1 + $0x8] sm:$0x3]  ;;  %285 = vmatprep.subr.bf16.mxu0 %v342_v2  ;;  %vm287_vm2 = vmpackc.low %vm35_vm0, %vm343_vm1  ;;  %289 = vmatprep.subr.bf16.mxu1 %v342_v2  ;;  %v345_v5 = vmov 0.0   ;;  %vm31_vm4 = vcmask 80896  }
   0x2   :  { %v286_v3 = vpack.c.bf16 %v23_v1, %v22_v0  ;;  %v110_v4 = vld [vmem:[%s455_s3] sm:$0xff]  ;;  %247 = vmatprep.mubr.msk.f32.mxu0 %vm344_vm3, %v345_v5  ;;  %v111_v6 = vld [vmem:[%s455_s3 + $0x8] sm:$0xff]  ;;  %v112_v7 = vld [vmem:[%s455_s3 + $0x10] sm:$0xff]  ;;  %282 = vmatprep.mubr.msk.f32.mxu1 %vm344_vm3, %v345_v5 }
   0x3   :  { %v113_v8 = vld [vmem:[%s455_s3 + $0x18] sm:$0xff]  ;;  %v21_v9 = vld [vmem:[%s452_s0] sm:$0xff]  ;;  %v290_v10 = vpack.c.bf16 %v111_v6, %v110_v4  ;;  %v115_v13 = vld [vmem:[%s455_s3 + $0x28] sm:$0xff] }
   0x4   :  { %288 = vmatpush3.bf16.msk.msra.mxu0 %vm287_vm2, %v286_v3  ;;  %v293_v11 = vpack.c.bf16 %v113_v8, %v112_v7  ;;  %v114_v12 = vld [vmem:[%s455_s3 + $0x20] sm:$0xff] }
   0x5   :  { %291 = vmatpush3.bf16.msra.mxu1 %v290_v10 }
   0x6   :  { %292 = vmatprep.subr.bf16.mxu1 %v342_v2 }
   0x7   :  { %248 = vmatmul.mubr.msk.f32.vlgmr.msra.gmra.mrb[0].mxu0 %vm31_vm4, %v21_v9 }
   0x8   :  { %10 = vsyncpa [#allocation3], 0  ;;  %v296_v14 = vpack.c.bf16 %v115_v13, %v114_v12  ;;  %v116_v15 = vld [vmem:[%s455_s3 + $0x30] sm:$0xff]  ;;  %v117_v16 = vld [vmem:[%s455_s3 + $0x38] sm:$0xff]  ;;  %s346_s7 = smov [#allocation2]   ;;  %vm203_vm5 = vcmask 39936  }
   0x9   :  { %294 = vmatpush3.bf16.msra.mxu1 %v293_v11  ;;  %v299_v17 = vpack.c.bf16 %v117_v16, %v116_v15  ;;  %v118_v18 = vld [vmem:[%s455_s3 + $0x40] sm:$0xff]  ;;  %v119_v19 = vld [vmem:[%s455_s3 + $0x48] sm:$0xff]  ;;  %v120_v21 = vld [vmem:[%s455_s3 + $0x50] sm:$0xff]  ;;  %s211_s8 = sshll.u32 %s346_s7, 4  ;;  %s212_s8 = int_to_ptr.vmem [resolvable:$true] %s211_s8 }
   0xa   :  { %295 = vmatprep.subr.bf16.mxu1 %v342_v2  ;;  %v302_v20 = vpack.c.bf16 %v119_v19, %v118_v18  ;;  %v121_v22 = vld [vmem:[%s455_s3 + $0x58] sm:$0xff]  ;;  %v122_v24 = vld [vmem:[%s455_s3 + $0x60] sm:$0xff]  ;;  %v123_v25 = vld [vmem:[%s455_s3 + $0x68] sm:$0xff]  ;;  %p323_p1 = scmp.lt.s32.totalorder %s212_s8, %s212_s8 }
   0xb   :  { %v305_v23 = vpack.c.bf16 %v121_v22, %v120_v21  ;;  %v308_v26 = vpack.c.bf16 %v123_v25, %v122_v24  ;;  %v124_v27 = vld [vmem:[%s455_s3 + $0x70] sm:$0xff]  ;;  %v125_v28 = vld [vmem:[%s455_s3 + $0x78] sm:$0xff]  ;;  %v219_v30 = vld [vmem:[%s454_s2] ss:$0 sm:$0xff]  ;;  %s318_s3 = scalar_lea.vmem %s212_s8, 128 }
   0xc   :  { %v311_v29 = vpack.c.bf16 %v125_v28, %v124_v27  ;;  %v222_v35 = vld [vmem:[%s456_s4] ss:$0 sm:$0xff]  ;;  %p319_p0 = scmp.ne.s32.totalorder %s212_s8, %s318_s3  ;;  %p324_p2 = scmp.lt.s32.totalorder %s318_s3, %s318_s3 }
   0xd   :  { %297 = vmatpush3.bf16.msra.mxu1 %v296_v14 }
   0xe   :  { %298 = vmatprep.subr.bf16.mxu1 %v342_v2  ;;  %p325_p3 = por %p324_p2, %p323_p1 }
  0x10   :  { %p326_p4 = pnand %p325_p3, %p319_p0 }
  0x11   :  { %300 = vmatpush3.bf16.msra.mxu1 %v299_v17 }
  0x12   :  { %301 = vmatprep.subr.bf16.mxu1 %v342_v2 }
  0x15   :  { %303 = vmatpush3.bf16.msra.mxu1 %v302_v20 }
  0x16   :  { %304 = vmatprep.subr.bf16.mxu1 %v342_v2 }
  0x19   :  { %306 = vmatpush3.bf16.msra.mxu1 %v305_v23 }
  0x1a   :  { %307 = vmatprep.subr.bf16.mxu1 %v342_v2 }
  0x1d   :  { %309 = vmatpush3.bf16.msra.mxu1 %v308_v26 }
  0x1e   :  { %310 = vmatprep.subr.bf16.mxu1 %v342_v2 }
  0x21   :  { %312 = vmatpush3.bf16.msra.mxu1 %v311_v29 }
  0xda   :  { %v105_v31 = vpop.f32.mrb[0].mxu0 }
  0xdb   :  { %v106_v32 = vadd.f32 %v219_v30, %v105_v31  ;;  %v249_v33 = vpop.f32.mrb[1].mxu0 }
  0xdd   :  { %v109_v34 = vmax.f32 %v106_v32, 0.0 }
  0xdf   :  { %283 = vmatmul.mubr.f32.vlgmr.msra.gmra.mrb[0].mxu1 %v109_v34 }
 0x1b2   :  { %v199_v36 = vpop.f32.mrb[0].mxu1 }
 0x1b3   :  { %v200_v37 = vadd.f32 %v222_v35, %v199_v36  ;;  %v284_v38 = vpop.f32.mrb[1].mxu1 }
 0x1b5   :  { %204 = vst.msk [vmem:[#allocation2] sm:$0xff] %vm203_vm5, %v200_v37 }
 0x1b6   :  { %329 = shalt.err (!%p326_p4)
}
 0x1b7   :  { %s330_s10 = scalar_lea.hbm %s457_s5, 128 }
 0x1b8   :  { %p331_p5 = scmp.ne.s32.totalorder %s457_s5, %s330_s10  ;;  %p334_p6 = scmp.lt.u32.totalorder %s330_s10, %s457_s5 }
 0x1ba   :  { %p336_p7 = pnand %p334_p6, %p331_p5 }
 0x1bc   :  { %339 = shalt.err (!%p336_p7)
}
 0x1bd   :  { %214 = dma.vmem_to_hbm [thread:$0]  %s212_s8, 128, %s457_s5, [#allocation3]  }
 0x1be   :  { %340 = dma.done.wait [#allocation3], 128  }
 0x1bf   :  { %341 = vsyncadd [#allocation3], 4294967168 }
 0x1c0   :  { %218 = vsyncpa [#allocation3], 1 }

</bundles_post_ra>
